<compile_context>
chip_gen: v6e
topology: v6e:2x2x1
jax: 0.10.0
libtpu: 0.0.40
codegen_flags: <defaults>
</compile_context>

<pallas_src>
import jax
import jax.numpy as jnp
from jax.experimental import pallas as pl
from jax.experimental.pallas import tpu as pltpu


def _softplus(z):
    # Numerically stable softplus (matches torch.nn.Softplus, beta=1).
    # exp/log go to the EUP; the max/abs/add are cheap VPU ops.
    return jnp.maximum(z, 0.0) + jnp.log1p(jnp.exp(-jnp.abs(z)))


def monot_iso_kernel(x_ref, slope_ref, bias_ref, pos_ref, monot_ref, o_ref):
    # x_ref:     (TB, F)  batch tile of the input
    # slope_ref: (1, F)   raw slope parameters
    # bias_ref:  (1, F)   bias
    # pos_ref:   (1, F)   positive_outs mask as f32 0/1
    # monot_ref: (1, F)   monot_outs mask as f32 0/1
    # o_ref:     (TB, F)  output tile
    x = x_ref[...].astype(jnp.float32)

    sp = _softplus(slope_ref[...].astype(jnp.float32))        # (1, F)
    monot = monot_ref[...] != 0.0                              # (1, F) bool
    slopes = jnp.where(monot, sp, -sp)                         # (1, F)

    out = x * slopes + bias_ref[...].astype(jnp.float32)       # (TB, F)

    positive = pos_ref[...] != 0.0                             # (1, F) bool
    pos_b = jnp.broadcast_to(positive, out.shape)
    out = jnp.where(pos_b, _softplus(out), out)

    o_ref[...] = out.astype(o_ref.dtype)


def monot_iso_linear_forward(x, slope_params, bias, positive_outs, monot_outs,
                             *, block_b=None):
    """x: [B, F]; slope_params/bias: [F]; positive_outs/monot_outs: bool [F].

    Returns [B, F] == MonotIsoLinear(features=F).forward(x) with the given
    parameters/buffers.  bias may be None (treated as zeros).
    """
    B, F = x.shape

    if bias is None:
        # TODO(synk): module supports bias=False; we realize it as a zero bias.
        bias = jnp.zeros((F,), dtype=x.dtype)

    # Batch tiling: single block at small B, 256-row tiles if B is large.
    if block_b is None:
        block_b = B if B <= 512 else 256
    grid_b = pl.cdiv(B, block_b)

    # Per-feature parameters as lane-aligned [1, F] rows (block == full array).
    slope2 = slope_params.reshape(1, F).astype(jnp.float32)
    bias2 = bias.reshape(1, F).astype(jnp.float32)
    pos2 = positive_outs.reshape(1, F).astype(jnp.float32)
    monot2 = monot_outs.reshape(1, F).astype(jnp.float32)

    return pl.pallas_call(
        monot_iso_kernel,
        out_shape=jax.ShapeDtypeStruct((B, F), x.dtype),
        grid_spec=pltpu.PrefetchScalarGridSpec(
            num_scalar_prefetch=0,
            grid=(grid_b,),
            in_specs=[
                pl.BlockSpec((block_b, F), lambda i: (i, 0)),
                pl.BlockSpec((1, F), lambda i: (0, 0)),
                pl.BlockSpec((1, F), lambda i: (0, 0)),
                pl.BlockSpec((1, F), lambda i: (0, 0)),
                pl.BlockSpec((1, F), lambda i: (0, 0)),
            ],
            out_specs=pl.BlockSpec((block_b, F), lambda i: (i, 0)),
        ),
        compiler_params=pltpu.CompilerParams(
            dimension_semantics=("parallel",),
        ),
    )(x, slope2, bias2, pos2, monot2)


if __name__ == "__main__":
    # Small shapes consistent with the module: batch=8 samples, features=128.
    B, F = 8, 128

    key = jax.random.PRNGKey(0)
    kx, ks, kb = jax.random.split(key, 3)

    x = jax.random.normal(kx, (B, F), dtype=jnp.float32)
    slope_params = jax.random.normal(ks, (F,), dtype=jnp.float32)
    bias = jax.random.normal(kb, (F,), dtype=jnp.float32)

    # Exercise both branches of each where():
    #   positive_outs: every 4th feature constrained positive.
    #   monot_outs:    alternating increasing / decreasing features.
    feat_idx = jnp.arange(F)
    positive_outs = (feat_idx % 4 == 0)
    monot_outs = (feat_idx % 2 == 0)

    out = monot_iso_linear_forward(x, slope_params, bias,
                                   positive_outs, monot_outs)
    out = jax.block_until_ready(out)

    # Pure-JAX reference of the PyTorch forward.
    sp = jax.nn.softplus(slope_params)
    slopes = jnp.where(monot_outs, sp, -sp)
    ref = x * slopes + bias
    ref = jnp.where(positive_outs, jax.nn.softplus(ref), ref)

    assert out.shape == (B, F)
    assert jnp.allclose(out, ref, atol=1e-5, rtol=1e-5)

    print("KERNEL_OK")
</pallas_src>

<mosaic_0001>
module attributes {stable_mosaic.version = 11 : i64} {
  func.func @monot_iso_kernel(%arg0: i32, %arg1: memref<8x128xf32, #tpu.memory_space<vmem>>, %arg2: memref<1x128xf32, #tpu.memory_space<vmem>>, %arg3: memref<1x128xf32, #tpu.memory_space<vmem>>, %arg4: memref<1x128xf32, #tpu.memory_space<vmem>>, %arg5: memref<1x128xf32, #tpu.memory_space<vmem>>, %arg6: memref<8x128xf32, #tpu.memory_space<vmem>>) attributes {dimension_semantics = [#tpu.dimension_semantics<parallel>], iteration_bounds = array<i64: 1>, scalar_prefetch = 0 : i64, scratch_operands = 0 : i64, tpu.core_type = #tpu.core_type<tc>, window_params = [{transform_indices = @transform_0, window_bounds = array<i64: 8, 128>}, {pipeline_mode = #tpu.pipeline_mode<synchronous>, transform_indices = @transform_1, window_bounds = array<i64: 1, 128>}, {pipeline_mode = #tpu.pipeline_mode<synchronous>, transform_indices = @transform_2, window_bounds = array<i64: 1, 128>}, {pipeline_mode = #tpu.pipeline_mode<synchronous>, transform_indices = @transform_3, window_bounds = array<i64: 1, 128>}, {pipeline_mode = #tpu.pipeline_mode<synchronous>, transform_indices = @transform_4, window_bounds = array<i64: 1, 128>}, {transform_indices = @transform_5, window_bounds = array<i64: 8, 128>}]} {
    %c0 = arith.constant 0 : index
    %c0_0 = arith.constant 0 : index
    %0 = vector.load %arg1[%c0, %c0_0] : memref<8x128xf32, #tpu.memory_space<vmem>>, vector<8x128xf32>
    %c0_1 = arith.constant 0 : index
    %c0_2 = arith.constant 0 : index
    %1 = vector.load %arg2[%c0_1, %c0_2] : memref<1x128xf32, #tpu.memory_space<vmem>>, vector<1x128xf32>
    %cst = arith.constant 0.000000e+00 : f32
    %2 = vector.broadcast %cst : f32 to vector<1x128xf32>
    %3 = arith.maximumf %1, %2 : vector<1x128xf32>
    %4 = math.absf %1 : vector<1x128xf32>
    %cst_3 = arith.constant 0.000000e+00 : f32
    %5 = vector.broadcast %cst_3 : f32 to vector<1x128xf32>
    %6 = arith.subf %5, %4 : vector<1x128xf32>
    %7 = math.exp %6 : vector<1x128xf32>
    %8 = math.log1p %7 : vector<1x128xf32>
    %9 = arith.addf %3, %8 : vector<1x128xf32>
    %c0_4 = arith.constant 0 : index
    %c0_5 = arith.constant 0 : index
    %10 = vector.load %arg5[%c0_4, %c0_5] : memref<1x128xf32, #tpu.memory_space<vmem>>, vector<1x128xf32>
    %cst_6 = arith.constant 0.000000e+00 : f32
    %11 = vector.broadcast %cst_6 : f32 to vector<1x128xf32>
    %12 = arith.cmpf one, %10, %11 : vector<1x128xf32>
    %cst_7 = arith.constant 0.000000e+00 : f32
    %13 = vector.broadcast %cst_7 : f32 to vector<1x128xf32>
    %14 = arith.subf %13, %9 : vector<1x128xf32>
    %15 = arith.select %12, %9, %14 : vector<1x128xi1>, vector<1x128xf32>
    %16 = vector.broadcast %15 : vector<1x128xf32> to vector<8x128xf32>
    %17 = arith.mulf %0, %16 : vector<8x128xf32>
    %c0_8 = arith.constant 0 : index
    %c0_9 = arith.constant 0 : index
    %18 = vector.load %arg3[%c0_8, %c0_9] : memref<1x128xf32, #tpu.memory_space<vmem>>, vector<1x128xf32>
    %19 = vector.broadcast %18 : vector<1x128xf32> to vector<8x128xf32>
    %20 = arith.addf %17, %19 : vector<8x128xf32>
    %c0_10 = arith.constant 0 : index
    %c0_11 = arith.constant 0 : index
    %21 = vector.load %arg4[%c0_10, %c0_11] : memref<1x128xf32, #tpu.memory_space<vmem>>, vector<1x128xf32>
    %cst_12 = arith.constant 0.000000e+00 : f32
    %22 = vector.broadcast %cst_12 : f32 to vector<1x128xf32>
    %23 = arith.cmpf one, %21, %22 : vector<1x128xf32>
    %24 = vector.shape_cast %23 : vector<1x128xi1> to vector<1x128xi1>
    %25 = vector.broadcast %24 : vector<1x128xi1> to vector<8x128xi1>
    %cst_13 = arith.constant 0.000000e+00 : f32
    %26 = vector.broadcast %cst_13 : f32 to vector<8x128xf32>
    %27 = arith.maximumf %20, %26 : vector<8x128xf32>
    %28 = math.absf %20 : vector<8x128xf32>
    %cst_14 = arith.constant 0.000000e+00 : f32
    %29 = vector.broadcast %cst_14 : f32 to vector<8x128xf32>
    %30 = arith.subf %29, %28 : vector<8x128xf32>
    %31 = math.exp %30 : vector<8x128xf32>
    %32 = math.log1p %31 : vector<8x128xf32>
    %33 = arith.addf %27, %32 : vector<8x128xf32>
    %34 = arith.select %25, %33, %20 : vector<8x128xi1>, vector<8x128xf32>
    %c0_15 = arith.constant 0 : index
    %c0_16 = arith.constant 0 : index
    %35 = vector.load %arg6[%c0_15, %c0_16] : memref<8x128xf32, #tpu.memory_space<vmem>>, vector<8x128xf32>
    tpu.vector_store %arg6[%c0_15, %c0_16], %34 {strides = array<i32>} : memref<8x128xf32, #tpu.memory_space<vmem>>, vector<8x128xf32>,
    return
  }
  func.func @transform_0(%arg0: i32) -> (i32, i32) {
    %c0_i32 = arith.constant 0 : i32
    %c0_i32_0 = arith.constant 0 : i32
    return %arg0, %c0_i32 : i32, i32
  }
  func.func @transform_1(%arg0: i32) -> (i32, i32) {
    %c0_i32 = arith.constant 0 : i32
    %c0_i32_0 = arith.constant 0 : i32
    %c0_i32_1 = arith.constant 0 : i32
    return %c0_i32, %c0_i32_0 : i32, i32
  }
  func.func @transform_2(%arg0: i32) -> (i32, i32) {
    %c0_i32 = arith.constant 0 : i32
    %c0_i32_0 = arith.constant 0 : i32
    %c0_i32_1 = arith.constant 0 : i32
    return %c0_i32, %c0_i32_0 : i32, i32
  }
  func.func @transform_3(%arg0: i32) -> (i32, i32) {
    %c0_i32 = arith.constant 0 : i32
    %c0_i32_0 = arith.constant 0 : i32
    %c0_i32_1 = arith.constant 0 : i32
    return %c0_i32, %c0_i32_0 : i32, i32
  }
  func.func @transform_4(%arg0: i32) -> (i32, i32) {
    %c0_i32 = arith.constant 0 : i32
    %c0_i32_0 = arith.constant 0 : i32
    %c0_i32_1 = arith.constant 0 : i32
    return %c0_i32, %c0_i32_0 : i32, i32
  }
  func.func @transform_5(%arg0: i32) -> (i32, i32) {
    %c0_i32 = arith.constant 0 : i32
    %c0_i32_0 = arith.constant 0 : i32
    return %arg0, %c0_i32 : i32, i32
  }
}

</mosaic_0001>

<bundles_post_ra>
// kernel: tpu_custom_call.1
= control target key start
LH: loop header
LB: loop body
LE: loop exit
PB: predicated region body
PF: predicated region fallthrough
CT: control target
= control target key end

     0   :  { %10 = vsyncpa [#allocation3], 0  ;;  %s216_s0 = inlined_call_operand.hbm [shape: f32[8,128], index: 0, kind: input, shape index: {}]   ;;  %s217_s1 = inlined_call_operand.vmem [shape: f32[1,128], index: 1, kind: input, shape index: {}]   ;;  %s218_s2 = inlined_call_operand.vmem [shape: f32[1,128], index: 2, kind: input, shape index: {}]   ;;  %s219_s3 = inlined_call_operand.vmem [shape: f32[1,128], index: 3, kind: input, shape index: {}]   ;;  %s220_s4 = inlined_call_operand.vmem [shape: f32[1,128], index: 4, kind: input, shape index: {}]   ;;  %s221_s5 = inlined_call_operand.hbm [shape: f32[8,128], index: 5, kind: output, shape index: {}]  }
   0x1   :  { %11 = vsyncpa [#allocation4], 0  ;;  %s165_s18 = smov [#allocation2]  }
   0x2   :  { %s18_s19 = sshll.u32 %s165_s18, 4  ;;  %s19_s19 = int_to_ptr.vmem [resolvable:$true] %s18_s19 }
   0x3   :  { %s129_s20 = scalar_lea.vmem %s19_s19, 128  ;;  %p134_p1 = scmp.lt.s32.totalorder %s19_s19, %s19_s19 }
   0x4   :  { %p130_p0 = scmp.ne.s32.totalorder %s19_s19, %s129_s20  ;;  %p135_p2 = scmp.lt.s32.totalorder %s129_s20, %s129_s20 }
   0x6   :  { %p136_p3 = por %p135_p2, %p134_p1 }
   0x8   :  { %p137_p4 = pnand %p136_p3, %p130_p0 }
   0xa   :  { %140 = shalt.err (!%p137_p4)
}
   0xb   :  { %21 = dma.hbm_to_vmem [thread:$0]  %s216_s0, 128, %s19_s19, [#allocation3]  }
   0xc   :  { %161 = dma.done.wait [#allocation3], 128  }
   0xd   :  { %162 = vsyncadd [#allocation3], 4294967168  ;;  %v34_v0 = vld [vmem:[%s217_s1] sm:$0x1]  ;;  %v55_v9 = vlaneseq  ;;  %v166_v34 = vmov 0  }
   0xe   :  { %v36_v1 = vand.u32 2147483647, %v34_v0  ;;  %v35_v12 = vmax.f32 %v34_v0, 0.0  ;;  %v50_v15 = vld [vmem:[%s220_s4] sm:$0x1] }
   0xf   :  { %v56_v14 = vshrl.u32 %v55_v9, 7  ;;  %vm51_vm1 = vcmp.ne.f32.partialorder %v50_v15, 0.0  ;;  %v33_v20 = vld [vmem:[#allocation2] sm:$0xff] }
  0x10   :  { %v37_v2 = vsub.f32 0.0, %v36_v1  ;;  %v109_v23 = vld [vmem:[%s218_s2] ss:$0 sm:$0xff]  ;;  %s167_s2 = smov [#allocation5]  }
  0x11   :  { %v57_v18 = vsub.s32 0, %v56_v14  ;;  %v69_v31 = vld [vmem:[%s219_s3] sm:$0x1]  ;;  %s100_s28 = sshll.u32 %s167_s2, 4  ;;  %s101_s28 = int_to_ptr.vmem [resolvable:$true] %s100_s28 }
  0x12   :  { %v38_v3 = vmul.f32 1.442695, %v37_v2  ;;  %vm70_vm2 = vcmp.ne.f32.partialorder %v69_v31, 0.0  ;;  %s141_s3 = scalar_lea.vmem %s101_s28, 128  ;;  %p146_p6 = scmp.lt.s32.totalorder %s101_s28, %s101_s28 }
  0x13   :  { %v71_v35 = vsel %vm70_vm2, 1, %v166_v34  ;;  %p142_p5 = scmp.ne.s32.totalorder %s101_s28, %s141_s3  ;;  %p147_p7 = scmp.lt.s32.totalorder %s141_s3, %s141_s3 }
  0x14   :  { %113 = vpow2.f32 %v38_v3  ;;  %v75_v37 = vrot.slane %v71_v35, %v57_v18 }
  0x15   :  { %p148_p8 = por %p147_p7, %p146_p6 }
  0x16   :  { %vm76_vm4 = vcmp.eq.s32.totalorder %v75_v37, 1 }
  0x17   :  { %p149_p9 = pnand %p148_p8, %p142_p5 }
  0x21   :  { %v114_v4 = vpop.eup %113 }
  0x22   :  { %v40_v5 = vadd.f32 1.0, %v114_v4  ;;  %v43_v6 = vmul.f32 -0.5, %v114_v4  ;;  %v46_v8 = vand.u32 2147483647, %v114_v4 }
  0x24   :  { %115 = vlog2.f32 %v40_v5  ;;  %v44_v7 = vadd.f32 1.0, %v43_v6  ;;  %vm47_vm0 = vcmp.lt.f32.partialorder %v46_v8, 0.0004427343 }
  0x26   :  { %v45_v10 = vmul.f32 %v114_v4, %v44_v7 }
  0x31   :  { %v116_v11 = vpop.eup %115 }
  0x32   :  { %v42_v13 = vmul.f32 0.6931472, %v116_v11 }
  0x34   :  { %v48_v16 = vsel %vm47_vm0, %v45_v10, %v42_v13 }
  0x35   :  { %v49_v17 = vadd.f32 %v48_v16, %v35_v12 }
  0x37   :  { %v52_v19 = vsub.f32 0.0, %v49_v17 }
  0x39   :  { %v53_v21 = vsel %vm51_vm1, %v49_v17, %v52_v19 }
  0x3a   :  { %v58_v22 = vrot.slane %v53_v21, %v57_v18 }
  0x3c   :  { %v60_v24 = vmul.f32 %v58_v22, %v33_v20 }
  0x3e   :  { %v68_v25 = vadd.f32 %v109_v23, %v60_v24 }
  0x40   :  { %v78_v26 = vand.u32 2147483647, %v68_v25  ;;  %v77_v40 = vmax.f32 %v68_v25, 0.0 }
  0x42   :  { %v79_v27 = vsub.f32 0.0, %v78_v26 }
  0x44   :  { %v80_v28 = vmul.f32 1.442695, %v79_v27 }
  0x46   :  { %117 = vpow2.f32 %v80_v28 }
  0x53   :  { %v118_v29 = vpop.eup %117 }
  0x54   :  { %v82_v30 = vadd.f32 1.0, %v118_v29  ;;  %v85_v32 = vmul.f32 -0.5, %v118_v29  ;;  %v88_v36 = vand.u32 2147483647, %v118_v29 }
  0x56   :  { %119 = vlog2.f32 %v82_v30  ;;  %v86_v33 = vadd.f32 1.0, %v85_v32  ;;  %vm89_vm3 = vcmp.lt.f32.partialorder %v88_v36, 0.0004427343 }
  0x58   :  { %v87_v38 = vmul.f32 %v118_v29, %v86_v33 }
  0x63   :  { %v120_v39 = vpop.eup %119 }
  0x64   :  { %v84_v41 = vmul.f32 0.6931472, %v120_v39 }
  0x66   :  { %v90_v42 = vsel %vm89_vm3, %v87_v38, %v84_v41 }
  0x67   :  { %v91_v43 = vadd.f32 %v90_v42, %v77_v40 }
  0x69   :  { %v92_v44 = vsel %vm76_vm4, %v91_v43, %v68_v25 }
  0x6a   :  { %93 = vst [vmem:[#allocation5] sm:$0xff] %v92_v44 }
  0x6b   :  { %152 = shalt.err (!%p149_p9)
}
  0x6c   :  { %103 = dma.vmem_to_hbm [thread:$0]  %s101_s28, 128, %s221_s5, [#allocation4]  }
  0x6d   :  { %163 = dma.done.wait [#allocation4], 128  }
  0x6e   :  { %164 = vsyncadd [#allocation4], 4294967168 }
  0x6f   :  { %107 = vsyncpa [#allocation3], 1 }
  0x70   :  { %108 = vsyncpa [#allocation4], 1 }

</bundles_post_ra>
